<compile_context>
chip_gen: v7x
topology: tpu7x:2x2x1
jax: 0.10.0
libtpu: 0.0.40
codegen_flags: <defaults>
</compile_context>

<pallas_src>
import jax
import jax.numpy as jnp
from jax.experimental import pallas as pl
from jax.experimental.pallas import tpu as pltpu


def _cdiv(a, b):
    return -(-a // b)


def _round_up(a, b):
    return _cdiv(a, b) * b


def _pixel_softmax_loss_kernel(x_ref, t_ref, o_ref):
    # x_ref: (k, S, 128) logits in their native dtype (f32 / bf16)
    # t_ref: (S, 128)    integer class targets (narrow dtypes stay narrow in HBM)
    # o_ref: (S, 128)    f32 loss, accumulated over the 3 color channels (last grid axis)
    c = pl.program_id(2)
    k = x_ref.shape[0]

    tgt = t_ref[...].astype(jnp.int32)                 # widen narrow targets in-register

    # running max over the k classes: chain of elementwise vreg maxes (VALU, no XLU)
    m = x_ref[0]
    for i in range(1, k):
        m = jnp.maximum(m, x_ref[i])

    # loss = log(sum_i exp(x_i - m)) - (x[tgt] - m)    (the +m / -m terms cancel)
    # exp-sum accumulates in f32; per-class math stays in the native dtype.
    d0 = x_ref[0] - m
    se = jnp.exp(d0).astype(jnp.float32)               # (S, 128) f32 accumulator
    sel = jnp.where(tgt == 0, d0, jnp.zeros_like(d0))  # (S, 128) native dtype
    for i in range(1, k):
        d = x_ref[i] - m
        se = se + jnp.exp(d).astype(jnp.float32)
        sel = jnp.where(tgt == i, d, sel)

    loss = jnp.log(se) - sel.astype(jnp.float32)       # (S, 128) f32

    @pl.when(c == 0)
    def _():
        o_ref[...] = loss

    @pl.when(c != 0)
    def _():
        o_ref[...] = o_ref[...] + loss


def _vmem_capacity_bytes():
    try:
        info = pltpu.get_tpu_info()
        cap = getattr(info, "vmem_capacity_bytes", None)
        if cap:
            return int(cap)
    except Exception:
        pass
    return 64 * 1024 * 1024  # conservative fallback = v7x per-TC VMEM


def pixel_softmax_loss(x, target, k):
    """x: (N, k*3, H, W) float; target: (N, 3, H, W) int.
    Returns (N, H, W) float32: per-pixel cross-entropy summed over the 3 channels."""
    N, Ck, H, W = x.shape
    assert Ck == 3 * k, f"expected {3 * k} channels, got {Ck}"
    HW = H * W

    # logits keep their native dtype (bf16 stream + bf16 in-kernel math on v6e/v7x);
    # anything other than f32/bf16 is widened to f32.
    if x.dtype not in (jnp.dtype(jnp.float32), jnp.dtype(jnp.bfloat16)):
        x = x.astype(jnp.float32)
    # targets stay narrow (int8 works) to shrink their HBM stream.
    if (not jnp.issubdtype(target.dtype, jnp.integer)) or target.dtype.itemsize > 4:
        target = target.astype(jnp.int32)

    x_item = x.dtype.itemsize
    t_item = target.dtype.itemsize

    # ---- tile selection ------------------------------------------------------
    R = _cdiv(HW, 128)                                  # number of 128-lane pixel rows
    vmem_cap = _vmem_capacity_bytes()
    budget = min(32 * 1024 * 1024, vmem_cap // 4)       # double-buffered DMA-block budget

    # VMEM bytes per (1, 128) pixel row: double-buffered x/t/out blocks plus a few
    # single-buffered f32 compute slabs (m, se, sel, d, loss).
    per_row = 2 * 128 * (k * x_item + t_item + 4) + 6 * 128 * 4
    s_vmem = max(8, budget // per_row)
    # cap the statically unrolled per-class loop size (k iterations x S/8 vregs each)
    s_code = max(32, (16384 // max(k, 1)) // 32 * 32)
    s_cap = max(8, min(s_vmem, s_code))

    if R <= s_cap:
        S, nS, R_pad = R, 1, R            # full-extent block: exempt from (8,128) rule
    else:
        nS = _cdiv(R, s_cap)
        S = _round_up(_cdiv(R, nS), 32)   # multiple of 32 covers f32/bf16/int8 tiling
        R_pad = S * nS
    # on dual-TensorCore parts (v7x) make sure the parallel axes have >= 2 blocks
    if N == 1 and nS == 1 and R >= 64:
        nS = 2
        S = _round_up(_cdiv(R, nS), 32)
        R_pad = S * nS

    # ---- layout: free contiguous reshapes + (rare) tail padding ---------------
    xr = x.reshape(N, k, 3, HW)
    tr = target.reshape(N, 3, HW)
    tail = R_pad * 128 - HW
    if tail:
        # TODO(synk): the tail is handled by padding (one extra HBM copy); a masked
        # tail tile would avoid the copy but is not worth the complexity here.
        xr = jnp.pad(xr, ((0, 0), (0, 0), (0, 0), (0, tail)))
        tr = jnp.pad(tr, ((0, 0), (0, 0), (0, tail)))
    xr = xr.reshape(N, k, 3, R_pad, 128)
    tr = tr.reshape(N, 3, R_pad, 128)

    # ---- VMEM limit from the actual footprint ---------------------------------
    x_block = k * S * 128 * x_item
    t_block = S * 128 * t_item
    o_block = S * 128 * 4
    need = 2 * (x_block + t_block + o_block) + 6 * S * 128 * 4 + (1 << 20)
    vmem_limit = int(min(vmem_cap * 3 // 4, max(16 * 1024 * 1024, 2 * need)))

    cost = pl.CostEstimate(
        flops=5 * N * 3 * R_pad * 128 * k,
        transcendentals=N * 3 * R_pad * 128 * (k + 1),
        bytes_accessed=xr.size * x_item + tr.size * t_item + N * R_pad * 128 * 4,
    )

    out = pl.pallas_call(
        _pixel_softmax_loss_kernel,
        out_shape=jax.ShapeDtypeStruct((N, R_pad, 128), jnp.float32),
        grid_spec=pltpu.PrefetchScalarGridSpec(
            num_scalar_prefetch=0,
            grid=(N, nS, 3),                           # channel reduction axis LAST
            in_specs=[
                pl.BlockSpec((None, k, None, S, 128), lambda n, s, c: (n, 0, c, s, 0)),
                pl.BlockSpec((None, None, S, 128), lambda n, s, c: (n, c, s, 0)),
            ],
            out_specs=pl.BlockSpec((None, S, 128), lambda n, s, c: (n, s, 0)),
        ),
        compiler_params=pltpu.CompilerParams(
            dimension_semantics=("parallel", "parallel", "arbitrary"),
            vmem_limit_bytes=vmem_limit),
        cost_estimate=cost,
    )(xr, tr)

    return out.reshape(N, R_pad * 128)[:, :HW].reshape(N, H, W)


def _reference(x, target, k):
    """Pure-JAX reference mirroring nn.CrossEntropyLoss(reduction='none')."""
    N, _, H, W = x.shape
    xr = x.reshape(N, k, 3, H, W).astype(jnp.float32)
    logp = jax.nn.log_softmax(xr, axis=1)                        # over the k classes
    tgt = target.astype(jnp.int32)                               # (N, 3, H, W)
    sel = jnp.take_along_axis(logp, tgt[:, None], axis=1)[:, 0]  # (N, 3, H, W)
    return -jnp.sum(sel, axis=1)                                 # (N, H, W)


if __name__ == "__main__":
    key = jax.random.PRNGKey(0)
    kx, kt, kx2, kt2, kx3 = jax.random.split(key, 5)

    # Case 1: f32 logits, int8 targets (narrow-target HBM path), H*W % 128 == 0.
    N, k, H, W = 2, 4, 16, 16
    x = jax.random.normal(kx, (N, k * 3, H, W), dtype=jnp.float32)
    target = jax.random.randint(kt, (N, 3, H, W), 0, k, dtype=jnp.int32)
    out = jax.block_until_ready(pixel_softmax_loss(x, target.astype(jnp.int8), k))
    ref = _reference(x, target, k)
    assert out.shape == (N, H, W)
    assert jnp.allclose(out, ref, atol=1e-4, rtol=1e-4), (
        f"f32 max abs err {jnp.max(jnp.abs(out - ref))}")

    # Case 2: H*W not a multiple of 128 (exercises the tail-padding path).
    H2, W2 = 10, 10
    x2 = jax.random.normal(kx2, (N, k * 3, H2, W2), dtype=jnp.float32)
    t2 = jax.random.randint(kt2, (N, 3, H2, W2), 0, k, dtype=jnp.int32)
    out2 = jax.block_until_ready(pixel_softmax_loss(x2, t2, k))
    ref2 = _reference(x2, t2, k)
    assert out2.shape == (N, H2, W2)
    assert jnp.allclose(out2, ref2, atol=1e-4, rtol=1e-4), (
        f"pad-path max abs err {jnp.max(jnp.abs(out2 - ref2))}")

    # Case 3: bf16 logits -> native bf16 in-kernel math with f32 accumulators.
    xb = jax.random.normal(kx3, (N, k * 3, H, W), dtype=jnp.float32).astype(jnp.bfloat16)
    outb = jax.block_until_ready(pixel_softmax_loss(xb, target, k))
    refb = _reference(xb.astype(jnp.float32), target, k)
    assert jnp.allclose(outb, refb, atol=0.15, rtol=0.05), (
        f"bf16 max abs err {jnp.max(jnp.abs(outb - refb))}")

    print("KERNEL_OK")
</pallas_src>

<mosaic_0001>
module attributes {stable_mosaic.version = 11 : i64} {
  func.func @_pixel_softmax_loss_kernel(%arg0: i32, %arg1: i32, %arg2: i32, %arg3: memref<1x4x1x2x128xf32, #tpu.memory_space<vmem>>, %arg4: memref<1x1x2x128xi8, #tpu.memory_space<vmem>>, %arg5: memref<1x2x128xf32, #tpu.memory_space<vmem>>) attributes {dimension_semantics = [#tpu.dimension_semantics<parallel>, #tpu.dimension_semantics<parallel>, #tpu.dimension_semantics<arbitrary>], iteration_bounds = array<i64: 2, 1, 3>, scalar_prefetch = 0 : i64, scratch_operands = 0 : i64, tpu.core_type = #tpu.core_type<tc>, window_params = [{transform_indices = @transform_0, window_bounds = array<i64: 1, 4, 1, 2, 128>}, {transform_indices = @transform_1, window_bounds = array<i64: 1, 1, 2, 128>}, {transform_indices = @transform_2, window_bounds = array<i64: 1, 2, 128>}]} {
    %c0 = arith.constant 0 : index
    %c0_0 = arith.constant 0 : index
    %c0_1 = arith.constant 0 : index
    %c0_2 = arith.constant 0 : index
    %0 = vector.load %arg4[%c0, %c0_0, %c0_1, %c0_2] : memref<1x1x2x128xi8, #tpu.memory_space<vmem>>, vector<1x1x2x128xi8>
    %1 = vector.shape_cast %0 : vector<1x1x2x128xi8> to vector<2x128xi8>
    %2 = arith.extsi %1 : vector<2x128xi8> to vector<2x128xi32>
    %c0_3 = arith.constant 0 : index
    %c0_4 = arith.constant 0 : index
    %c0_5 = arith.constant 0 : index
    %c0_6 = arith.constant 0 : index
    %c0_7 = arith.constant 0 : index
    %3 = vector.load %arg3[%c0_3, %c0_4, %c0_5, %c0_6, %c0_7] : memref<1x4x1x2x128xf32, #tpu.memory_space<vmem>>, vector<1x1x1x2x128xf32>
    %4 = vector.shape_cast %3 : vector<1x1x1x2x128xf32> to vector<2x128xf32>
    %c0_8 = arith.constant 0 : index
    %c1 = arith.constant 1 : index
    %c0_9 = arith.constant 0 : index
    %c0_10 = arith.constant 0 : index
    %c0_11 = arith.constant 0 : index
    %5 = vector.load %arg3[%c0_8, %c1, %c0_9, %c0_10, %c0_11] : memref<1x4x1x2x128xf32, #tpu.memory_space<vmem>>, vector<1x1x1x2x128xf32>
    %6 = vector.shape_cast %5 : vector<1x1x1x2x128xf32> to vector<2x128xf32>
    %7 = arith.maximumf %4, %6 : vector<2x128xf32>
    %c0_12 = arith.constant 0 : index
    %c2 = arith.constant 2 : index
    %c0_13 = arith.constant 0 : index
    %c0_14 = arith.constant 0 : index
    %c0_15 = arith.constant 0 : index
    %8 = vector.load %arg3[%c0_12, %c2, %c0_13, %c0_14, %c0_15] : memref<1x4x1x2x128xf32, #tpu.memory_space<vmem>>, vector<1x1x1x2x128xf32>
    %9 = vector.shape_cast %8 : vector<1x1x1x2x128xf32> to vector<2x128xf32>
    %10 = arith.maximumf %7, %9 : vector<2x128xf32>
    %c0_16 = arith.constant 0 : index
    %c3 = arith.constant 3 : index
    %c0_17 = arith.constant 0 : index
    %c0_18 = arith.constant 0 : index
    %c0_19 = arith.constant 0 : index
    %11 = vector.load %arg3[%c0_16, %c3, %c0_17, %c0_18, %c0_19] : memref<1x4x1x2x128xf32, #tpu.memory_space<vmem>>, vector<1x1x1x2x128xf32>
    %12 = vector.shape_cast %11 : vector<1x1x1x2x128xf32> to vector<2x128xf32>
    %13 = arith.maximumf %10, %12 : vector<2x128xf32>
    %c0_20 = arith.constant 0 : index
    %c0_21 = arith.constant 0 : index
    %c0_22 = arith.constant 0 : index
    %c0_23 = arith.constant 0 : index
    %c0_24 = arith.constant 0 : index
    %14 = vector.load %arg3[%c0_20, %c0_21, %c0_22, %c0_23, %c0_24] : memref<1x4x1x2x128xf32, #tpu.memory_space<vmem>>, vector<1x1x1x2x128xf32>
    %15 = vector.shape_cast %14 : vector<1x1x1x2x128xf32> to vector<2x128xf32>
    %16 = arith.subf %15, %13 : vector<2x128xf32>
    %17 = math.exp %16 : vector<2x128xf32>
    %c0_i32 = arith.constant 0 : i32
    %18 = vector.broadcast %c0_i32 : i32 to vector<2x128xi32>
    %19 = arith.cmpi eq, %2, %18 : vector<2x128xi32>
    %cst = arith.constant 0.000000e+00 : f32
    %20 = vector.broadcast %cst : f32 to vector<2x128xf32>
    %21 = arith.select %19, %16, %20 : vector<2x128xi1>, vector<2x128xf32>
    %c0_25 = arith.constant 0 : index
    %c1_26 = arith.constant 1 : index
    %c0_27 = arith.constant 0 : index
    %c0_28 = arith.constant 0 : index
    %c0_29 = arith.constant 0 : index
    %22 = vector.load %arg3[%c0_25, %c1_26, %c0_27, %c0_28, %c0_29] : memref<1x4x1x2x128xf32, #tpu.memory_space<vmem>>, vector<1x1x1x2x128xf32>
    %23 = vector.shape_cast %22 : vector<1x1x1x2x128xf32> to vector<2x128xf32>
    %24 = arith.subf %23, %13 : vector<2x128xf32>
    %25 = math.exp %24 : vector<2x128xf32>
    %26 = arith.addf %17, %25 : vector<2x128xf32>
    %c1_i32 = arith.constant 1 : i32
    %27 = vector.broadcast %c1_i32 : i32 to vector<2x128xi32>
    %28 = arith.cmpi eq, %2, %27 : vector<2x128xi32>
    %29 = arith.select %28, %24, %21 : vector<2x128xi1>, vector<2x128xf32>
    %c0_30 = arith.constant 0 : index
    %c2_31 = arith.constant 2 : index
    %c0_32 = arith.constant 0 : index
    %c0_33 = arith.constant 0 : index
    %c0_34 = arith.constant 0 : index
    %30 = vector.load %arg3[%c0_30, %c2_31, %c0_32, %c0_33, %c0_34] : memref<1x4x1x2x128xf32, #tpu.memory_space<vmem>>, vector<1x1x1x2x128xf32>
    %31 = vector.shape_cast %30 : vector<1x1x1x2x128xf32> to vector<2x128xf32>
    %32 = arith.subf %31, %13 : vector<2x128xf32>
    %33 = math.exp %32 : vector<2x128xf32>
    %34 = arith.addf %26, %33 : vector<2x128xf32>
    %c2_i32 = arith.constant 2 : i32
    %35 = vector.broadcast %c2_i32 : i32 to vector<2x128xi32>
    %36 = arith.cmpi eq, %2, %35 : vector<2x128xi32>
    %37 = arith.select %36, %32, %29 : vector<2x128xi1>, vector<2x128xf32>
    %c0_35 = arith.constant 0 : index
    %c3_36 = arith.constant 3 : index
    %c0_37 = arith.constant 0 : index
    %c0_38 = arith.constant 0 : index
    %c0_39 = arith.constant 0 : index
    %38 = vector.load %arg3[%c0_35, %c3_36, %c0_37, %c0_38, %c0_39] : memref<1x4x1x2x128xf32, #tpu.memory_space<vmem>>, vector<1x1x1x2x128xf32>
    %39 = vector.shape_cast %38 : vector<1x1x1x2x128xf32> to vector<2x128xf32>
    %40 = arith.subf %39, %13 : vector<2x128xf32>
    %41 = math.exp %40 : vector<2x128xf32>
    %42 = arith.addf %34, %41 : vector<2x128xf32>
    %c3_i32 = arith.constant 3 : i32
    %43 = vector.broadcast %c3_i32 : i32 to vector<2x128xi32>
    %44 = arith.cmpi eq, %2, %43 : vector<2x128xi32>
    %45 = arith.select %44, %40, %37 : vector<2x128xi1>, vector<2x128xf32>
    %46 = math.log %42 : vector<2x128xf32>
    %47 = arith.subf %46, %45 : vector<2x128xf32>
    %c0_i32_40 = arith.constant 0 : i32
    %48 = arith.cmpi eq, %arg2, %c0_i32_40 : i32
    %49 = arith.extui %48 : i1 to i32
    %c0_i32_41 = arith.constant 0 : i32
    %50 = arith.cmpi ne, %49, %c0_i32_41 : i32
    scf.if %50 {
      %c0_44 = arith.constant 0 : index
      %c0_45 = arith.constant 0 : index
      %c0_46 = arith.constant 0 : index
      %54 = vector.load %arg5[%c0_44, %c0_45, %c0_46] : memref<1x2x128xf32, #tpu.memory_space<vmem>>, vector<1x2x128xf32>
      %55 = vector.shape_cast %54 : vector<1x2x128xf32> to vector<2x128xf32>
      %56 = vector.shape_cast %47 : vector<2x128xf32> to vector<1x2x128xf32>
      tpu.vector_store %arg5[%c0_44, %c0_45, %c0_46], %56 {strides = array<i32>} : memref<1x2x128xf32, #tpu.memory_space<vmem>>, vector<1x2x128xf32>,
    } else {
    }
    %c0_i32_42 = arith.constant 0 : i32
    %51 = arith.cmpi ne, %arg2, %c0_i32_42 : i32
    %52 = arith.extui %51 : i1 to i32
    %c0_i32_43 = arith.constant 0 : i32
    %53 = arith.cmpi ne, %52, %c0_i32_43 : i32
    scf.if %53 {
      %c0_44 = arith.constant 0 : index
      %c0_45 = arith.constant 0 : index
      %c0_46 = arith.constant 0 : index
      %54 = vector.load %arg5[%c0_44, %c0_45, %c0_46] : memref<1x2x128xf32, #tpu.memory_space<vmem>>, vector<1x2x128xf32>
      %55 = vector.shape_cast %54 : vector<1x2x128xf32> to vector<2x128xf32>
      %56 = arith.addf %55, %47 : vector<2x128xf32>
      %c0_47 = arith.constant 0 : index
      %c0_48 = arith.constant 0 : index
      %c0_49 = arith.constant 0 : index
      %57 = vector.load %arg5[%c0_47, %c0_48, %c0_49] : memref<1x2x128xf32, #tpu.memory_space<vmem>>, vector<1x2x128xf32>
      %58 = vector.shape_cast %57 : vector<1x2x128xf32> to vector<2x128xf32>
      %59 = vector.shape_cast %56 : vector<2x128xf32> to vector<1x2x128xf32>
      tpu.vector_store %arg5[%c0_47, %c0_48, %c0_49], %59 {strides = array<i32>} : memref<1x2x128xf32, #tpu.memory_space<vmem>>, vector<1x2x128xf32>,
    } else {
    }
    return
  }
  func.func @transform_0(%arg0: i32, %arg1: i32, %arg2: i32) -> (i32, i32, i32, i32, i32) {
    %c0_i32 = arith.constant 0 : i32
    %c0_i32_0 = arith.constant 0 : i32
    %c0_i32_1 = arith.constant 0 : i32
    return %arg0, %c0_i32, %arg2, %arg1, %c0_i32_0 : i32, i32, i32, i32, i32
  }
  func.func @transform_1(%arg0: i32, %arg1: i32, %arg2: i32) -> (i32, i32, i32, i32) {
    %c0_i32 = arith.constant 0 : i32
    %c0_i32_0 = arith.constant 0 : i32
    return %arg0, %arg2, %arg1, %c0_i32 : i32, i32, i32, i32
  }
  func.func @transform_2(%arg0: i32, %arg1: i32, %arg2: i32) -> (i32, i32, i32) {
    %c0_i32 = arith.constant 0 : i32
    %c0_i32_0 = arith.constant 0 : i32
    return %arg0, %arg1, %c0_i32 : i32, i32, i32
  }
}

</mosaic_0001>

<bundles_post_ra>
// kernel: tpu_custom_call.1
= control target key start
LH: loop header
LB: loop body
LE: loop exit
PB: predicated region body
PF: predicated region fallthrough
CT: control target
= control target key end

     0   :  { %7 = vsyncpa [#allocation3], 0  ;;  %s935_s0 = inlined_call_operand.hbm [shape: f32[2,4,3,2,128], index: 0, kind: input, shape index: {}]   ;;  %s936_s1 = inlined_call_operand.vmem [shape: s8[2,3,2,128], index: 1, kind: input, shape index: {}]   ;;  %s937_s2 = inlined_call_operand.hbm [shape: f32[2,2,128], index: 2, kind: output, shape index: {}]  }
   0x1   :  { %9 = vsyncpa [#allocation3 + $0x1], 0 }
   0x2   :  { %10 = vsyncpa [#allocation4], 0 }
   0x3   :  { %12 = vsyncpa [#allocation4 + $0x1], 0  ;;  %s708_s9 = smov 0   ;;  %s710_s10 = smov 0  }
   0x4   :  { %s712_s11 = smov 0   ;;  %s714_s12 = smov 0  }
   0x5   :  { %s716_s13 = smov 0   ;;  %s718_s14 = smov 0  }
   0x6   :  { %s720_s15 = smov 0   ;;  %s722_s16 = smov 0  }
   0x7   :  { %s724_s17 = smov 0   ;;  %s726_s18 = smov 0  }
   0x8   :  { %s728_s19 = smov 0  }
   0x9 LB: > { %s399_s20 = sadd.s32 4294967295, %s686_s19   ;;  %s400_s21 = sadd.s32 4294967294, %s686_s19   ;;  %s686_s19 = sphi %s728_s19, %s18_s19   ;;  %s682_s18 = sphi %s726_s18, %s958_s18   ;;  %s678_s17 = sphi %s724_s17, %s957_s17   ;;  %s674_s16 = sphi %s722_s16, %s956_s16   ;;  %s670_s15 = sphi %s720_s15, %s955_s15   ;;  %s666_s14 = sphi %s718_s14, %s954_s14   ;;  %s662_s13 = sphi %s716_s13, %s953_s13   ;;  %s658_s12 = sphi %s714_s12, %s952_s12   ;;  %s654_s11 = sphi %s712_s11, %s951_s11   ;;  %s650_s10 = sphi %s710_s10, %s950_s10   ;;  %s646_s9 = sphi %s708_s9, %s949_s9  }
   0xa   : > { %s30_s22 = sadd.s32 1, %s678_s17  ;;  %s37_s23 = sadd.s32 1, %s682_s18 }
   0xb   : > { %p31_p0 = scmp.ge.s32.totalorder %s30_s22, 3  ;;  %s48_s24 = sadd.s32 1, %s666_s14 }
   0xc   : > { %p55_p1 = scmp.ne.s32.totalorder %s666_s14, %s662_s13  ;;  %p56_p2 = scmp.eq.s32.totalorder %s686_s19, 0 }
   0xd   : > { %s960_s22 = smov (%p31_p0, %s30_s22), 0  ;;  %s962_s23 = smov (!%p31_p0, %s37_s23), %s682_s18 }
   0xe   : > { %s42_s25 = ssub.s32 %s678_s17, %s960_s22  ;;  %p774_p3 = por %p56_p2, %p55_p1 }
   0xf   : > { %p39_p4 = scmp.ge.s32.totalorder %s962_s23, 2  ;;  %p61_p5 = scmp.ne.s32.totalorder %s662_s13, %s658_s12 }
  0x10   : > { %p62_p6 = scmp.eq.s32.totalorder %s399_s20, 0  ;;  %s106_s27 = sadd.s32 1, %s654_s11 }
  0x11   : > { %s964_s23 = smov (%p39_p4, %s962_s23), 0  ;;  %p116_p8 = scmp.ne.s32.totalorder %s654_s11, %s650_s10 }
  0x12   : > { %941 = sst [smem:[#allocation8_spill]] %s964_s23  ;;  %p782_p7 = por %p62_p6, %p61_p5 }
  0x13   : > { %s41_s29 = ssub.s32 %s682_s18, %s964_s23  ;;  %p117_p9 = scmp.eq.s32.totalorder %s399_s20, 5 }
  0x14   : > { %s43_s30 = sor.u32 %s42_s25, %s41_s29  ;;  %p104_p10 = scmp.eq.s32.totalorder %s41_s29, 0 }
  0x15   : > { %p46_p11 = scmp.eq.s32.totalorder %s43_s30, 0  ;;  %p790_p12 = por %p117_p9, %p116_p8 }
  0x16   : > { %s795_s4 = scalar_select %p104_p10, %s654_s11, %s106_s27  }
  0x17   : > { %s943_s3 = scalar_select %p790_p12, 1, 0 }
  0x18   : > { %s798_s5 = scalar_select %p46_p11, %s666_s14, %s48_s24  }
  0x19   : > { %p122_p13 = scmp.ne.s32.totalorder %s650_s10, %s646_s9  ;;  %p123_p0 = scmp.eq.s32.totalorder %s400_s21, 5 }
  0x1a   : > { %p431_p1 = scmp.lt.s32.totalorder %s686_s19, 6  ;;  %s143_s7 = sand.u32 1, %s666_s14  }
  0x1b   : > { %p803_p2 = por %p123_p0, %p122_p13  ;;  %s403_s8 = sshll.u32 %s143_s7, 3 }
  0x1c   : > { %s417_s12 = smul.u32 12, %s682_s18  ;;  %s147_s20 = scalar_lea.vmem [#allocation2], %s403_s8 }
  0x1d   : > { %s944_s6 = scalar_select %p803_p2, 1, 0 }
  0x1e   : > { %s156_s25 = sshll.u32 %s147_s20, 4  ;;  %p811_p4 = pnand %p431_p1, %p774_p3  ;;  %s816_s25 = int_to_ptr.vmem [resolvable:$true] %s156_s25 }
  0x1f   : > { %s153_s24 = sadd.s32 %s678_s17, %s417_s12  ;;  %s823_s26 = scalar_lea.sflag [#allocation3], %s143_s7 }
  0x20   : > { %s404_s21 = sshll.u32 %s153_s24, 5  ;;  %p536_p5 = pneg %p811_p4 }
  0x21   : > { %s821_s23 = scalar_lea.hbm %s935_s0, %s404_s21  ;;  %s539_s24 = scalar_lea.hbm %s935_s0, 768 }
  0x22   : > { %s534_s8 = scalar_lea.hbm %s821_s23, 128  ;;  %p540_p9 = scmp.lt.u32.totalorder %s821_s23, %s935_s0 }
  0x23   : > { %p535_p3 = scmp.ne.s32.totalorder %s821_s23, %s534_s8  ;;  %p541_p10 = scmp.lt.u32.totalorder %s539_s24, %s534_s8 }
  0x24   : > { %p543_p13 = scmp.lt.u32.totalorder %s534_s8, %s821_s23 }
  0x25   : > { %p537_p6 = pnand %p536_p5, %p535_p3  ;;  %p542_p11 = por %p541_p10, %p540_p9 }
  0x27   : > { %p538_p8 = pneg %p537_p6  ;;  %p544_p0 = por %p543_p13, %p542_p11 }
  0x29   : > { %p545_p1 = pnand %p544_p0, %p538_p8 }
  0x2b   : > { %548 = shalt.err (!%p545_p1)
}
  0x2c   : > { %s549_s7 = scalar_lea.vmem %s816_s25, 128  ;;  %s688_s30 = smov [#allocation2]  }
  0x2d   : > { %p550_p3 = scmp.ne.s32.totalorder %s816_s25, %s549_s7  ;;  %s554_s12 = sshll.u32 %s688_s30, 4  ;;  %s555_s12 = int_to_ptr.vmem [resolvable:$false] %s554_s12 }
  0x2e   : > { %s556_s20 = scalar_lea.vmem %s555_s12, 256  ;;  %p557_p12 = scmp.lt.s32.totalorder %s816_s25, %s555_s12 }
  0x2f   : > { %p552_p6 = pnand %p550_p3, %p536_p5  ;;  %p558_p9 = scmp.lt.s32.totalorder %s556_s20, %s549_s7 }
  0x31   : > { %p553_p2 = pneg %p552_p6  ;;  %p559_p10 = por %p558_p9, %p557_p12 }
  0x33   : > { %p560_p11 = pnand %p559_p10, %p553_p2 }
  0x35   : > { %563 = shalt.err (!%p560_p11)
}
  0x36   : > { %s689_s8 = smov 96   ;;  %s690_s24 = smov 32  }
  0x37   : > { %s691_s21 = smov 2   ;;  %p405_p5 = scmp.ge.s32.totalorder %s686_s19, 1 }
  0x38   : > { %426 = dma.hbm_to_vmem [thread:$0]  (!%p811_p4), %s821_s23, 128, %s816_s25, %s823_s26, %s689_s8, %s690_s24, %s691_s21  }
  0x39   : > { %p177_p8 = scmp.lt.s32.totalorder %s686_s19, 7 }
  0x3b   : > { %p178_p13 = pnand %p405_p5, %p177_p8 }
  0x3c   : > { %s183_s27 = sand.u32 (!%p178_p13), 1, %s662_s13  }
  0x3d   : > { %181 = sbr.rel (%p178_p13) target bundleno = 149 (0x95), region = 28  ;;  %s406_s7 = sshll.u32 (!%p178_p13), %s183_s27, 3 }
  0x3e   : > { %s184_s30 = scalar_lea.sflag (!%p178_p13), [#allocation3], %s183_s27  ;;  %s187_s12 = scalar_lea.vmem (!%p178_p13), [#allocation2], %s406_s7 }
  0x44   : > { %637 = dma.done.wait (%p782_p7), %s184_s30, 128  }
  0x45   : > { %639 = vsyncadd (%p782_p7), %s184_s30, 4294967168  ;;  %s215_s23 = sand.u32 1, %s650_s10   ;;  %v230_v0 = vld [vmem:[%s187_s12] sm:$0x3]  ;;  %v408_v1 = vld [vmem:[%s187_s12 + $0x2] sm:$0x3] }
  0x46   : > { %s861_s25 = sshll.u32 %s215_s23, 1  ;;  %v409_v2 = vld [vmem:[%s187_s12 + $0x4] sm:$0x3]  ;;  %v233_v3 = vmax.f32 %v230_v0, %v408_v1  ;;  %p218_p12 = scmp.lt.s32.totalorder %s674_s16, 1  ;;  %v410_v4 = vld [vmem:[%s187_s12 + $0x6] sm:$0x3] }
  0x47   : > { %p220_p2 = scmp.lt.s32.totalorder %s670_s15, 2  ;;  %s217_s27 = scalar_lea.vmem [#allocation5], %s861_s25 }
  0x48   : > { %v236_v5 = vmax.f32 %v233_v3, %v409_v2  ;;  %s219_s28 = scalar_select %p218_p12, %s674_s16, 1 }
  0x49   : > { %s221_s29 = scalar_select %p220_p2, %s670_s15, 2 }
  0x4a   : > { %v239_v6 = vmax.f32 %v236_v5, %v410_v4  ;;  %s418_s26 = smul.u32 3, %s219_s28  ;;  %p411_p7 = scmp.ne.s32.totalorder %s670_s15, 0 }
  0x4c   : > { %v240_v7 = vsub.f32 %v230_v0, %v239_v6  ;;  %v245_v8 = vsub.f32 %v408_v1, %v239_v6  ;;  %v251_v9 = vsub.f32 %v409_v2, %v239_v6  ;;  %v257_v10 = vsub.f32 %v410_v4, %v239_v6  ;;  %s226_s20 = sadd.s32 %s418_s26, %s221_s29 }
  0x4d   : > { %s227_s21 = scalar_lea.vmem %s936_s1, %s226_s20 }
  0x4e   : > { %v241_v11 = vmul.f32 1.442695, %v240_v7  ;;  %v246_v12 = vmul.f32 1.442695, %v245_v8  ;;  %v252_v13 = vmul.f32 1.442695, %v251_v9 }
  0x4f   : > { %v258_v14 = vmul.f32 1.442695, %v257_v10  ;;  %v228_v15 = vld [vmem:[%s227_s21] sm:$0x1] }
  0x50   : > { %524 = vpow2.f32 %v241_v11  ;;  %v229_v19 = vunpack.c.0.s8 %v228_v15 }
  0x51   : > { %526 = vpow2.f32 %v246_v12 }
  0x52   : > { %528 = vpow2.f32 %v252_v13  ;;  %vm243_vm0 = vcmp.eq.s32.totalorder %v229_v19, 0  ;;  %vm249_vm1 = vcmp.eq.s32.totalorder %v229_v19, 1  ;;  %vm255_vm2 = vcmp.eq.s32.totalorder %v229_v19, 2 }
  0x53   : > { %530 = vpow2.f32 %v258_v14  ;;  %v244_v24 = vsel %vm243_vm0, %v240_v7, 0.0  ;;  %vm261_vm3 = vcmp.eq.s32.totalorder %v229_v19, 3 }
  0x54   : > { %v250_v25 = vsel %vm249_vm1, %v245_v8, %v244_v24 }
  0x55   : > { %v256_v26 = vsel %vm255_vm2, %v251_v9, %v250_v25 }
  0x56   : > { %v262_v28 = vsel %vm261_vm3, %v257_v10, %v256_v26 }
  0x5a   : > { %v525_v16 = vpop.eup %524 }
  0x5b   : > { %v527_v17 = vpop.eup %526 }
  0x5c   : > { %v529_v18 = vpop.eup %528  ;;  %v248_v20 = vadd.f32 %v527_v17, %v525_v16 }
  0x5d   : > { %v531_v21 = vpop.eup %530 }
  0x5e   : > { %v254_v22 = vadd.f32 %v529_v18, %v248_v20 }
  0x60   : > { %v260_v23 = vadd.f32 %v531_v21, %v254_v22 }
  0x62   : > { %532 = vlog2.f32 %v260_v23 }
  0x69   : > { %269 = sbr.rel (%p411_p7) target bundleno = 114 (0x72), region = 36 }
  0x6c   : > { %v533_v27 = vpop.eup %532 }
  0x6d   : > { %v264_v29 = vmul.f32 0.6931472, %v533_v27 }
  0x6f   : > { %v265_v30 = vsub.f32 %v264_v29, %v262_v28 }
  0x71   : > { %270 = vst [vmem:[%s217_s27] sm:$0x3] %v265_v30 }
  0x72 PF: > { %p412_p4 = scmp.eq.s32.totalorder %s670_s15, 0 }
  0x74   : > { %274 = sbr.rel (%p412_p4) target bundleno = 124 (0x7c), region = 40 }
  0x78   : > { %v275_v31 = vld [vmem:[%s217_s27] sm:$0x3] (!%p412_p4) }
  0x79   : > { %v276_v32 = vadd.f32 (!%p412_p4), %v275_v31, %v265_v30 }
  0x7b   : > { %277 = vst [vmem:[%s217_s27] sm:$0x3] %v276_v32 }
  0x7c PF: > { %s414_s7 = sshll.u32 %s674_s16, 5  ;;  %s293_s28 = sshll.u32 %s217_s27, 4  ;;  %s294_s28 = int_to_ptr.vmem [resolvable:$true] %s293_s28 }
  0x7d   : > { %s877_s25 = scalar_lea.hbm %s937_s2, %s414_s7  ;;  %s279_s29 = scalar_lea.sflag [#allocation4], %s215_s23 }
  0x7e   : > { %s564_s26 = scalar_lea.vmem %s294_s28, 32  ;;  %p946_p1 = scmp.ne.s32.totalorder %s943_s3, 0 }
  0x7f   : > { %p565_p0 = scmp.ne.s32.totalorder %s294_s28, %s564_s26  ;;  %s692_s15 = smov [#allocation5]  }
  0x80   : > { %s568_s20 = sshll.u32 %s692_s15, 4  ;;  %s569_s20 = int_to_ptr.vmem [resolvable:$false] %s568_s20 }
  0x81   : > { %p566_p3 = pnand %p565_p0, %p946_p1  ;;  %s570_s8 = scalar_lea.vmem %s569_s20, 64 }
  0x82   : > { %p571_p9 = scmp.lt.s32.totalorder %s294_s28, %s569_s20  ;;  %p572_p10 = scmp.lt.s32.totalorder %s570_s8, %s564_s26 }
  0x83   : > { %p567_p6 = pneg %p566_p3 }
  0x84   : > { %p573_p11 = por %p572_p10, %p571_p9 }
  0x86   : > { %p574_p5 = pnand %p573_p11, %p567_p6 }
  0x88   : > { %577 = shalt.err (!%p574_p5)
}
  0x89   : > { %s578_s16 = scalar_lea.hbm %s877_s25, 32  ;;  %s582_s21 = scalar_lea.hbm %s937_s2, 64 }
  0x8a   : > { %p579_p8 = scmp.ne.s32.totalorder %s877_s25, %s578_s16  ;;  %p583_p2 = scmp.lt.u32.totalorder %s877_s25, %s937_s2 }
  0x8b   : > { %p584_p7 = scmp.lt.u32.totalorder %s582_s21, %s578_s16  ;;  %p586_p0 = scmp.lt.u32.totalorder %s578_s16, %s877_s25 }
  0x8c   : > { %p580_p13 = pnand %p579_p8, %p946_p1 }
  0x8d   : > { %p585_p4 = por %p584_p7, %p583_p2 }
  0x8e   : > { %p581_p12 = pneg %p580_p13 }
  0x8f   : > { %p587_p3 = por %p586_p0, %p585_p4 }
  0x91   : > { %p588_p6 = pnand %p587_p3, %p581_p12 }
  0x93   : > { %591 = shalt.err (!%p588_p6)
}
  0x94   : > { %421 = dma.vmem_to_hbm [thread:$0]  (%p946_p1), %s294_s28, 32, %s877_s25, %s279_s29  }
  0x95 PF: > { %p432_p9 = scmp.ge.s32.totalorder %s686_s19, 2  ;;  %s305_s30 = sand.u32 1, %s646_s9  }
  0x96   : > { %p947_p10 = scmp.ne.s32.totalorder %s944_s6, 0  ;;  %s306_s12 = scalar_lea.sflag [#allocation4], %s305_s30 }
  0x98   : > { %p428_p11 = pnand %p432_p9, %p947_p10 }
  0x9a   : > { %641 = dma.done.wait (!%p428_p11), %s306_s12, 32  }
  0x9b   : > { %643 = vsyncadd (!%p428_p11), %s306_s12, 4294967264  ;;  %s18_s19 = sadd.s32 1, %s686_s19   ;;  %s948_s3 = sld [smem:[#allocation8_spill]] }
  0x9c   : > { %p15_p5 = scmp.ge.s32.totalorder %s18_s19, 8   ;;  %s949_s9 = smov %s650_s10 }
  0x9d   : > { %s950_s10 = smov %s654_s11  ;;  %s951_s11 = smov %s795_s4 }
  0x9e   : > { %s952_s12 = smov %s662_s13  ;;  %s953_s13 = smov %s666_s14 }
  0x9f   : > { %s954_s14 = smov %s798_s5  ;;  %s955_s15 = smov %s678_s17 }
  0xa0   : > { %s956_s16 = smov %s682_s18  ;;  %s957_s17 = smov %s960_s22 }
  0xa1   : > { %s958_s18 = smov %s948_s3  ;;  %17 = sbr.rel (!%p15_p5) target bundleno = 9 (0x9), region = 87 }
  0xa8   :  { %311 = vsyncpa [#allocation3], 1 }
  0xa9   :  { %313 = vsyncpa [#allocation3 + $0x1], 1 }
  0xaa   :  { %314 = vsyncpa [#allocation4], 1 }
  0xab   :  { %316 = vsyncpa [#allocation4 + $0x1], 1 }

</bundles_post_ra>
